<compile_context>
chip_gen: v7x
topology: tpu7x:2x2x1
jax: 0.10.0
libtpu: 0.0.40
codegen_flags: <defaults>
</compile_context>

<pallas_src>
import functools

import jax
import jax.numpy as jnp
from jax.experimental import pallas as pl
from jax.experimental.pallas import tpu as pltpu


def _normalization_kernel(scale_ref, bias_ref, img_ref, out_ref):
    # scale_ref / bias_ref : (Rb, 1) f32 fused affine params for these rows
    # img_ref   / out_ref  : (Rb, Lb) tile of the flattened (N*C, H*W) image
    x = img_ref[...].astype(jnp.float32)
    out_ref[...] = (x * scale_ref[...] + bias_ref[...]).astype(out_ref.dtype)


def _device_tuning():
    """(target_tile_bytes, vmem_limit_bytes) tuned per TPU generation."""
    try:
        kind = jax.devices()[0].device_kind.lower()
    except Exception:  # pragma: no cover - be conservative if query fails
        kind = ""
    if "v7" in kind or "7x" in kind:
        # ~6 MiB tiles -> ~24 MiB double-buffered in+out; raise scoped VMEM.
        return 6 * 1024 * 1024, 48 << 20
    if "v6" in kind or "6e" in kind:
        # ~4 MiB tiles fit the 32 MiB scoped default without any flag.
        return 4 * 1024 * 1024, None
    # v5e (16 MiB scoped default) and anything unknown: stay at 2 MiB.
    return 2 * 1024 * 1024, None


def _choose_blocks(R, L, itemsize, target_tile_bytes):
    """Pick (rb, lb) so tiles are ~target_tile_bytes and layout-legal."""
    # Dtype-aware sublane multiple: 8 for f32, 16 for bf16, 32 for int8/fp8.
    sub = max(8, 32 // itemsize)
    target_elems = max(1, target_tile_bytes // itemsize)

    # Lane block: prefer the full H*W extent; only tile lanes when even a
    # minimal row group (min(R, sub) rows) would blow the tile budget.
    rows_hint = max(1, min(R, sub))
    max_lb = max(1, target_elems // rows_hint)
    if L <= max_lb:
        lb = L                                   # full extent: always legal
    else:
        lb = max(128, (max_lb // 128) * 128)     # multiple of lane width
        lb = min(lb, L)

    # Row block: full R if it fits, otherwise a multiple of the sublane tile.
    max_rows = max(1, target_elems // lb)
    if R <= max_rows:
        rb = R                                   # full extent: always legal
    else:
        rb = max(sub, (max_rows // sub) * sub)
        rb = min(rb, R)
    return rb, lb


@functools.partial(
    jax.jit, static_argnames=("rb", "lb", "lanes_first", "vmem_limit"))
def _normalization_impl(img, mean, std, *, rb, lb, lanes_first, vmem_limit):
    N, C, H, W = img.shape
    R = N * C
    L = H * W

    # Fused affine parameters, expanded to one scalar per flattened row.
    scale = (1.0 / std).astype(jnp.float32)                   # (C,)
    bias = (-mean / std).astype(jnp.float32)                  # (C,)
    scale_rows = jnp.broadcast_to(scale[None, :], (N, C)).reshape(R, 1)
    bias_rows = jnp.broadcast_to(bias[None, :], (N, C)).reshape(R, 1)

    img2 = img.reshape(R, L)

    grid_r = pl.cdiv(R, rb)
    grid_l = pl.cdiv(L, lb)

    if lanes_first:
        grid = (grid_l, grid_r)
        img_map = lambda j, i: (i, j)
        row_map = lambda j, i: (i, 0)
    else:
        grid = (grid_r, grid_l)
        img_map = lambda i, j: (i, j)
        row_map = lambda i, j: (i, 0)

    out = pl.pallas_call(
        _normalization_kernel,
        out_shape=jax.ShapeDtypeStruct((R, L), img.dtype),
        grid=grid,
        in_specs=[
            pl.BlockSpec((rb, 1), row_map),    # scale rows (tiny, row-keyed)
            pl.BlockSpec((rb, 1), row_map),    # bias rows  (tiny, row-keyed)
            pl.BlockSpec((rb, lb), img_map),   # image tile
        ],
        out_specs=pl.BlockSpec((rb, lb), img_map),
        compiler_params=pltpu.CompilerParams(
            dimension_semantics=("parallel", "parallel"),
            vmem_limit_bytes=vmem_limit,
        ),
        # NOTE: no input_output_aliases — the input is not donated, and
        # aliasing a non-donated jit parameter forces a defensive HBM copy.
    )(scale_rows, bias_rows, img2)

    return out.reshape(N, C, H, W)


def normalization(img, mean, std):
    """(img - mean[:, None, None]) / std[:, None, None] for NCHW img."""
    N, C, H, W = img.shape
    R = N * C
    L = H * W
    itemsize = jnp.dtype(img.dtype).itemsize

    target_tile_bytes, vmem_limit = _device_tuning()
    rb, lb = _choose_blocks(R, L, itemsize, target_tile_bytes)

    # Put the grid axis with the most blocks first so megacore (v7x) sharding
    # across the leading parallel axis actually has work to split.
    lanes_first = pl.cdiv(L, lb) > pl.cdiv(R, rb)

    return _normalization_impl(
        img, mean, std,
        rb=rb, lb=lb, lanes_first=lanes_first, vmem_limit=vmem_limit)


if __name__ == "__main__":
    key = jax.random.PRNGKey(0)

    N, C, H, W = 2, 4, 16, 16
    img = jax.random.normal(key, (N, C, H, W), dtype=jnp.float32)

    # Deterministic per-channel statistics (as would be passed to __init__).
    mean = jnp.array([0.485, 0.456, 0.406, 0.500], dtype=jnp.float32)
    std = jnp.array([0.229, 0.224, 0.225, 0.250], dtype=jnp.float32)

    out = normalization(img, mean, std)
    out = jax.block_until_ready(out)

    # Reference (plain JAX), matching PyTorch broadcasting semantics.
    ref = (img - mean[None, :, None, None]) / std[None, :, None, None]

    assert out.shape == img.shape and out.dtype == img.dtype
    # Fused scale/bias differs from subtract-then-divide by a few f32 ulps.
    assert jnp.allclose(out, ref, atol=1e-5, rtol=1e-5)

    print("KERNEL_OK")
</pallas_src>

<mosaic_0001>
module attributes {stable_mosaic.version = 11 : i64} {
  func.func @_normalization_kernel(%arg0: i32, %arg1: i32, %arg2: memref<8x1xf32, #tpu.memory_space<vmem>>, %arg3: memref<8x1xf32, #tpu.memory_space<vmem>>, %arg4: memref<8x256xf32, #tpu.memory_space<vmem>>, %arg5: memref<8x256xf32, #tpu.memory_space<vmem>>) attributes {dimension_semantics = [#tpu.dimension_semantics<parallel>, #tpu.dimension_semantics<parallel>], iteration_bounds = array<i64: 1, 1>, scalar_prefetch = 0 : i64, scratch_operands = 0 : i64, tpu.core_type = #tpu.core_type<tc>, window_params = [{transform_indices = @transform_0, window_bounds = array<i64: 8, 1>}, {transform_indices = @transform_1, window_bounds = array<i64: 8, 1>}, {transform_indices = @transform_2, window_bounds = array<i64: 8, 256>}, {transform_indices = @transform_3, window_bounds = array<i64: 8, 256>}]} {
    %c0 = arith.constant 0 : index
    %c0_0 = arith.constant 0 : index
    %0 = vector.load %arg4[%c0, %c0_0] : memref<8x256xf32, #tpu.memory_space<vmem>>, vector<8x256xf32>
    %c0_1 = arith.constant 0 : index
    %c0_2 = arith.constant 0 : index
    %1 = vector.load %arg2[%c0_1, %c0_2] : memref<8x1xf32, #tpu.memory_space<vmem>>, vector<8x1xf32>
    %2 = vector.broadcast %1 : vector<8x1xf32> to vector<8x256xf32>
    %3 = arith.mulf %0, %2 : vector<8x256xf32>
    %c0_3 = arith.constant 0 : index
    %c0_4 = arith.constant 0 : index
    %4 = vector.load %arg3[%c0_3, %c0_4] : memref<8x1xf32, #tpu.memory_space<vmem>>, vector<8x1xf32>
    %5 = vector.broadcast %4 : vector<8x1xf32> to vector<8x256xf32>
    %6 = arith.addf %3, %5 : vector<8x256xf32>
    %c0_5 = arith.constant 0 : index
    %c0_6 = arith.constant 0 : index
    %7 = vector.load %arg5[%c0_5, %c0_6] : memref<8x256xf32, #tpu.memory_space<vmem>>, vector<8x256xf32>
    tpu.vector_store %arg5[%c0_5, %c0_6], %6 {strides = array<i32>} : memref<8x256xf32, #tpu.memory_space<vmem>>, vector<8x256xf32>,
    return
  }
  func.func @transform_0(%arg0: i32, %arg1: i32) -> (i32, i32) {
    %c0_i32 = arith.constant 0 : i32
    %c0_i32_0 = arith.constant 0 : i32
    return %arg0, %c0_i32 : i32, i32
  }
  func.func @transform_1(%arg0: i32, %arg1: i32) -> (i32, i32) {
    %c0_i32 = arith.constant 0 : i32
    %c0_i32_0 = arith.constant 0 : i32
    return %arg0, %c0_i32 : i32, i32
  }
  func.func @transform_2(%arg0: i32, %arg1: i32) -> (i32, i32) {
    %c0_i32 = arith.constant 0 : i32
    return %arg0, %arg1 : i32, i32
  }
  func.func @transform_3(%arg0: i32, %arg1: i32) -> (i32, i32) {
    %c0_i32 = arith.constant 0 : i32
    return %arg0, %arg1 : i32, i32
  }
}

</mosaic_0001>

<bundles_post_ra>
// kernel: _normalization_impl.1
= control target key start
LH: loop header
LB: loop body
LE: loop exit
PB: predicated region body
PF: predicated region fallthrough
CT: control target
= control target key end

     0   :  { %v40_v0 = vmov 0   ;;  %s79_s0 = inlined_call_operand.vmem [shape: f32[8,1], index: 0, kind: input, shape index: {}]   ;;  %s80_s1 = inlined_call_operand.vmem [shape: f32[8,1], index: 1, kind: input, shape index: {}]   ;;  %s81_s2 = inlined_call_operand.vmem [shape: f32[8,256], index: 2, kind: input, shape index: {}]   ;;  %s82_s3 = inlined_call_operand.vmem [shape: f32[8,256], index: 3, kind: output, shape index: {}]  }
   0x1   :  { %39 = vset.pattern.permute.xlu0 %v40_v0  ;;  %v16_v1 = vld [vmem:[%s79_s0] sm:$0xff]  ;;  %v15_v4 = vld [vmem:[%s81_s2 + $0x8] sm:$0xff] }
   0x2   :  { %19 = vperm.xlu0 %39, %v16_v1   ;;  %v24_v2 = vld [vmem:[%s80_s1] sm:$0xff] }
   0x3   :  { %v14_v3 = vld [vmem:[%s81_s2] sm:$0xff] }
   0x6   :  { %27 = vperm.xlu0 %39, %v24_v2  }
  0x81   :  { %v20_v5 = vpop.permute.xlu0 %19 }
  0x82   :  { %v22_v6 = vmul.f32 %v20_v5, %v14_v3  ;;  %v23_v7 = vmul.f32 %v20_v5, %v15_v4 }
  0x85   :  { %v28_v8 = vpop.permute.xlu0 %27 }
  0x86   :  { %v30_v9 = vadd.f32 %v28_v8, %v22_v6  ;;  %v31_v10 = vadd.f32 %v28_v8, %v23_v7 }
  0x88   :  { %32 = vst [vmem:[%s82_s3] sm:$0xff] %v30_v9  ;;  %33 = vst [vmem:[%s82_s3 + $0x8] sm:$0xff] %v31_v10 }

</bundles_post_ra>
